<compile_context>
chip_gen: v7x
topology: tpu7x:2x2x1
jax: 0.10.0
libtpu: 0.0.40
codegen_flags: <defaults>
</compile_context>

<pallas_src>
import math
import functools

import jax
import jax.numpy as jnp
from jax import lax
from jax.experimental import pallas as pl
from jax.experimental.pallas import tpu as pltpu

_NEG_LARGE = -1e30                    # finite "-inf" (f32-safe, avoids inf-inf NaNs)
_VMEM_LIMIT = 64 * 1024 * 1024        # raised above the 32 MiB scoped default


def _pick_sublane_tile(dim, preferred=(256, 128, 64, 32, 16, 8)):
    """Tile for a second-to-last block dim: a multiple of 8 that divides, else full."""
    for c in preferred:
        if dim % c == 0:
            return c
    return dim


def _pick_lane_tile(dim, preferred=(512, 256, 128)):
    """Tile for a last (lane) block dim: a multiple of 128 that divides, else full."""
    for c in preferred:
        if dim % c == 0:
            return c
    return dim


# ----------------------- 1) Tiled linear (QKV projection) -----------------------

def _tiled_linear_kernel(x_ref, w_ref, o_ref, acc_ref):
    @pl.when(pl.program_id(2) == 0)
    def _():
        acc_ref[...] = jnp.zeros_like(acc_ref)

    acc_ref[...] += jnp.dot(x_ref[...], w_ref[...],
                            preferred_element_type=jnp.float32)

    @pl.when(pl.program_id(2) == pl.num_programs(2) - 1)
    def _():
        o_ref[...] = acc_ref[...].astype(o_ref.dtype)


def pallas_linear(x, w):
    """x: (M, K) @ w: (K, N) -> (M, N), tiled with a K-reduction f32 accumulator."""
    M, K = x.shape
    K2, N = w.shape
    assert K == K2
    tm = _pick_sublane_tile(M)
    tk = _pick_lane_tile(K)
    tn = _pick_lane_tile(N)
    return pl.pallas_call(
        _tiled_linear_kernel,
        out_shape=jax.ShapeDtypeStruct((M, N), x.dtype),
        grid=(M // tm, N // tn, K // tk),
        in_specs=[
            pl.BlockSpec((tm, tk), lambda i, j, k: (i, k)),
            pl.BlockSpec((tk, tn), lambda i, j, k: (k, j)),
        ],
        out_specs=pl.BlockSpec((tm, tn), lambda i, j, k: (i, j)),
        scratch_shapes=[pltpu.VMEM((tm, tn), jnp.float32)],
        compiler_params=pltpu.CompilerParams(
            dimension_semantics=("parallel", "parallel", "arbitrary"),
            vmem_limit_bytes=_VMEM_LIMIT,
        ),
    )(x, w)


# ----------------------- 2) Split heads + RoPE (pre-applied once) -----------------------

def _split_rope_kernel(x_ref, cos_ref, sin_ref, q_ref, k_ref, v_ref,
                       *, num_heads, head_dim, scale):
    """fused_qkv block (ts, 3*hidden) -> per-head q (scaled+rotated), k (rotated), v.

    sin_ref already has the rotate_half sign folded in (first half negated), so
    rotate_half(x) * sin == roll(x, D/2) * sin_signed; the roll is done here once,
    outside the attention loop.
    """
    x = x_ref[0]                 # (ts, 3*hidden) f32
    cos = cos_ref[...]           # (ts, D)
    sin = sin_ref[...]           # (ts, D), sign-folded
    half = head_dim // 2

    for h in range(num_heads):   # static unroll; classic Falcon layout (H, 3, D)
        base = h * 3 * head_dim
        q = x[:, base: base + head_dim]
        k = x[:, base + head_dim: base + 2 * head_dim]
        v = x[:, base + 2 * head_dim: base + 3 * head_dim]

        def _roll_half(t):
            return jnp.concatenate([t[:, half:], t[:, :half]], axis=-1)

        q_rot = (q * cos + _roll_half(q) * sin) * scale   # fold softmax scale into q
        k_rot = k * cos + _roll_half(k) * sin

        q_ref[0, h] = q_rot.astype(q_ref.dtype)
        k_ref[0, h] = k_rot.astype(k_ref.dtype)
        v_ref[0, h] = v.astype(v_ref.dtype)


def pallas_split_rope(fused_qkv, cos, sin_signed, num_heads, head_dim, scale,
                      attn_dtype=jnp.bfloat16):
    """fused_qkv: (B, S, 3*hidden) -> q, k, v each (B, H, S, D) in attn_dtype."""
    B, S, three_h = fused_qkv.shape
    ts = _pick_sublane_tile(S)
    kernel = functools.partial(_split_rope_kernel, num_heads=num_heads,
                               head_dim=head_dim, scale=scale)
    out_sds = jax.ShapeDtypeStruct((B, num_heads, S, head_dim), attn_dtype)
    out_spec = pl.BlockSpec((1, num_heads, ts, head_dim), lambda b, si: (b, 0, si, 0))
    return pl.pallas_call(
        kernel,
        out_shape=(out_sds, out_sds, out_sds),
        grid=(B, S // ts),
        in_specs=[
            pl.BlockSpec((1, ts, three_h), lambda b, si: (b, si, 0)),
            pl.BlockSpec((ts, head_dim), lambda b, si: (si, 0)),
            pl.BlockSpec((ts, head_dim), lambda b, si: (si, 0)),
        ],
        out_specs=(out_spec, out_spec, out_spec),
        compiler_params=pltpu.CompilerParams(
            dimension_semantics=("parallel", "parallel"),
            vmem_limit_bytes=_VMEM_LIMIT,
        ),
    )(fused_qkv, cos, sin_signed)


# ----------------------- 3) Causal flash attention (online softmax) -----------------------

def _flash_attn_kernel(q_ref, k_ref, v_ref, o_ref, m_ref, l_ref, acc_ref, *, tq, tk):
    qi = pl.program_id(1)
    ki = pl.program_id(2)
    nk = pl.num_programs(2)

    @pl.when(ki == 0)
    def _init():
        m_ref[...] = jnp.full(m_ref.shape, _NEG_LARGE, m_ref.dtype)
        l_ref[...] = jnp.zeros_like(l_ref)
        acc_ref[...] = jnp.zeros_like(acc_ref)

    q_first = qi * tq
    q_last = q_first + tq - 1
    kv_start = ki * tk
    kv_last = kv_start + tk - 1

    def _update(masked):
        q = q_ref[0]             # (tq, D) bf16, softmax scale pre-folded into q
        k = k_ref[0]             # (tk, D) bf16
        s = lax.dot_general(q, k, (((1,), (1,)), ((), ())),
                            preferred_element_type=jnp.float32)      # (tq, tk) f32
        if masked:
            # element-level causal mask (global indices) — diagonal blocks only
            row = q_first + lax.broadcasted_iota(jnp.int32, (tq, tk), 0)
            col = kv_start + lax.broadcasted_iota(jnp.int32, (tq, tk), 1)
            s = jnp.where(col <= row, s, _NEG_LARGE)

        m_prev = m_ref[...]                                          # (tq, 1)
        m_new = jnp.maximum(m_prev, jnp.max(s, axis=-1, keepdims=True))
        alpha = jnp.exp(m_prev - m_new)
        p = jnp.exp(s - m_new)                                       # f32 stats
        l_ref[...] = alpha * l_ref[...] + jnp.sum(p, axis=-1, keepdims=True)
        pv = jnp.dot(p.astype(v_ref.dtype), v_ref[0],
                     preferred_element_type=jnp.float32)             # (tq, D)
        acc_ref[...] = alpha * acc_ref[...] + pv
        m_ref[...] = m_new

    # Fully-visible blocks (strictly below the diagonal): skip the mask iota/select.
    fully_visible = kv_last <= q_first
    # Diagonal blocks: need the element-level mask.  Blocks past the last query
    # row (kv_start > q_last) are skipped entirely (causal block skipping).
    on_diagonal = jnp.logical_and(kv_start <= q_last,
                                  jnp.logical_not(fully_visible))

    @pl.when(fully_visible)
    def _full():
        _update(masked=False)

    @pl.when(on_diagonal)
    def _diag():
        _update(masked=True)

    @pl.when(ki == nk - 1)
    def _finalize():
        inv_l = pl.reciprocal(l_ref[...], approx=True)
        o_ref[0] = (acc_ref[...] * inv_l).astype(o_ref.dtype)


def pallas_flash_attention(q, k, v, out_dtype):
    """q, k, v: (B*H, S, D) (bf16, q pre-scaled).  Returns (B*H, S, D) in out_dtype."""
    BH, S, D = q.shape
    tq = _pick_sublane_tile(S)
    tk = tq
    kernel = functools.partial(_flash_attn_kernel, tq=tq, tk=tk)
    return pl.pallas_call(
        kernel,
        out_shape=jax.ShapeDtypeStruct((BH, S, D), out_dtype),
        grid=(BH, S // tq, S // tk),
        in_specs=[
            pl.BlockSpec((1, tq, D), lambda b, qi, ki: (b, qi, 0)),
            pl.BlockSpec((1, tk, D), lambda b, qi, ki: (b, ki, 0)),
            pl.BlockSpec((1, tk, D), lambda b, qi, ki: (b, ki, 0)),
        ],
        out_specs=pl.BlockSpec((1, tq, D), lambda b, qi, ki: (b, qi, 0)),
        scratch_shapes=[
            pltpu.VMEM((tq, 1), jnp.float32),   # running max m
            pltpu.VMEM((tq, 1), jnp.float32),   # running sum l
            pltpu.VMEM((tq, D), jnp.float32),   # output accumulator
        ],
        compiler_params=pltpu.CompilerParams(
            dimension_semantics=("parallel", "parallel", "arbitrary"),
            vmem_limit_bytes=_VMEM_LIMIT,
        ),
    )(q, k, v)


# ----------------------- 4) Head merge + dense projection (fused) -----------------------

def _head_merge_dense_kernel(a_ref, w_ref, o_ref, acc_ref):
    h = pl.program_id(3)

    @pl.when(h == 0)
    def _():
        acc_ref[...] = jnp.zeros_like(acc_ref)

    acc_ref[...] += jnp.dot(a_ref[0, 0], w_ref[0],
                            preferred_element_type=jnp.float32)

    @pl.when(h == pl.num_programs(3) - 1)
    def _():
        o_ref[0] = acc_ref[...].astype(o_ref.dtype)


def pallas_head_merge_dense(attn, w_dense):
    """attn: (B, H, S, D), w_dense: (H*D, hidden) -> (B, S, hidden).

    Consumes the attention output directly in (B, H, S, D) layout (no transpose /
    merge-heads copy): out[b,s,:] = sum_h attn[b,h,s,:] @ w_dense[h*D:(h+1)*D, :].
    """
    B, H, S, D = attn.shape
    hidden = w_dense.shape[1]
    w3 = w_dense.reshape(H, D, hidden)          # free reshape (split leading dim)
    ts = _pick_sublane_tile(S)
    tn = _pick_lane_tile(hidden)
    return pl.pallas_call(
        _head_merge_dense_kernel,
        out_shape=jax.ShapeDtypeStruct((B, S, hidden), w_dense.dtype),
        grid=(B, S // ts, hidden // tn, H),
        in_specs=[
            pl.BlockSpec((1, 1, ts, D), lambda b, si, nj, h: (b, h, si, 0)),
            pl.BlockSpec((1, D, tn), lambda b, si, nj, h: (h, 0, nj)),
        ],
        out_specs=pl.BlockSpec((1, ts, tn), lambda b, si, nj, h: (b, si, nj)),
        scratch_shapes=[pltpu.VMEM((ts, tn), jnp.float32)],
        compiler_params=pltpu.CompilerParams(
            dimension_semantics=("parallel", "parallel", "parallel", "arbitrary"),
            vmem_limit_bytes=_VMEM_LIMIT,
        ),
    )(attn, w3)


# ----------------------------- Model wrapper -----------------------------

def init_params(key, hidden_size, num_heads, dtype=jnp.float32):
    """Deterministic parameter init. Weights stored as [in, out]."""
    qkv_out_dim = 3 * hidden_size  # classic (non-MQA) Falcon architecture
    k1, k2 = jax.random.split(key)
    scale = 1.0 / math.sqrt(hidden_size)
    w_qkv = jax.random.normal(k1, (hidden_size, qkv_out_dim), dtype) * scale
    w_dense = jax.random.normal(k2, (hidden_size, hidden_size), dtype) * scale
    return {"w_qkv": w_qkv, "w_dense": w_dense}


def _rope_tables(seq_len, head_dim, rope_theta):
    """FalconRotaryEmbedding tables, with the rotate_half sign folded into sin."""
    inv_freq = 1.0 / (rope_theta ** (
        jnp.arange(0, head_dim, 2, dtype=jnp.float32) / head_dim))
    t = jnp.arange(seq_len, dtype=jnp.float32)
    freqs = jnp.outer(t, inv_freq)                              # (S, D/2)
    emb = jnp.concatenate([freqs, freqs], axis=-1)              # (S, D)
    cos = jnp.cos(emb)
    sin = jnp.sin(emb)
    sign = jnp.concatenate([-jnp.ones((head_dim // 2,), jnp.float32),
                            jnp.ones((head_dim // 2,), jnp.float32)])
    return cos, sin * sign


def falcon_flash_attention2_forward(params, hidden_states, num_heads,
                                    rope_theta=10000.0):
    """Forward of FalconFlashAttention2 (alibi=None, no cache, no dropout).

    hidden_states: (B, S, hidden) -> attn_output: (B, S, hidden)
    Returns (attn_output, past_key_value=None, attn_weights=None).
    """
    B, S, hidden = hidden_states.shape
    head_dim = hidden // num_heads

    # fused_qkv = self.query_key_value(hidden_states)   (tiled Pallas matmul)
    x2d = hidden_states.reshape(B * S, hidden)
    fused_qkv = pallas_linear(x2d, params["w_qkv"])             # (B*S, 3*hidden)
    fused_qkv = fused_qkv.reshape(B, S, 3 * hidden)

    # _split_heads + apply_rotary_pos_emb in one Pallas pass, emitting (B, H, S, D)
    # bf16 q/k/v (mirrors the torch flash path's cast to half precision); softmax
    # scale folded into q once.
    cos, sin_signed = _rope_tables(S, head_dim, rope_theta)
    scale = 1.0 / math.sqrt(head_dim)
    q, k, v = pallas_split_rope(fused_qkv, cos, sin_signed, num_heads, head_dim,
                                scale, attn_dtype=jnp.bfloat16)

    # causal flash attention over (B*H, S, D)  (leading-dim merge is free)
    BH = B * num_heads
    attn = pallas_flash_attention(q.reshape(BH, S, head_dim),
                                  k.reshape(BH, S, head_dim),
                                  v.reshape(BH, S, head_dim),
                                  out_dtype=hidden_states.dtype)
    attn = attn.reshape(B, num_heads, S, head_dim)              # free reshape

    # merge heads + attn_output = self.dense(...) fused (no wrapper transpose)
    out = pallas_head_merge_dense(attn, params["w_dense"])      # (B, S, hidden)

    # use_cache=False, output_attentions=False
    # TODO(synk): kv-cache concat (layer_past), attention dropout, alibi, padding
    # attention_mask handling, and pseudo_quantize_tensor (kv_bit < 16) paths are
    # not exercised in this config.
    return out, None, None


# ----------------------------- Pure-JAX reference (for sanity) -----------------------------

def _reference_forward(params, hidden_states, num_heads, rope_theta=10000.0):
    B, S, hidden = hidden_states.shape
    D = hidden // num_heads
    fused = hidden_states.reshape(B * S, hidden) @ params["w_qkv"]
    fused = fused.reshape(B, S, num_heads, 3, D)
    q = jnp.transpose(fused[..., 0, :], (0, 2, 1, 3))
    k = jnp.transpose(fused[..., 1, :], (0, 2, 1, 3))
    v = jnp.transpose(fused[..., 2, :], (0, 2, 1, 3))
    inv_freq = 1.0 / (rope_theta ** (jnp.arange(0, D, 2, dtype=jnp.float32) / D))
    t = jnp.arange(S, dtype=jnp.float32)
    emb = jnp.concatenate([jnp.outer(t, inv_freq)] * 2, axis=-1)
    cos, sin = jnp.cos(emb), jnp.sin(emb)

    def rot(x):
        return jnp.concatenate([-x[..., D // 2:], x[..., :D // 2]], axis=-1)

    q = q * cos + rot(q) * sin
    k = k * cos + rot(k) * sin
    s = jnp.einsum("bhqd,bhkd->bhqk", q, k) / math.sqrt(D)
    mask = jnp.tril(jnp.ones((S, S), dtype=bool))
    s = jnp.where(mask, s, -jnp.inf)
    p = jax.nn.softmax(s, axis=-1)
    o = jnp.einsum("bhqk,bhkd->bhqd", p, v)
    o = jnp.transpose(o, (0, 2, 1, 3)).reshape(B * S, hidden)
    return (o @ params["w_dense"]).reshape(B, S, hidden)


# ----------------------------- Main -----------------------------

if __name__ == "__main__":
    batch = 2
    seq = 8
    hidden = 32
    num_heads = 4  # head_dim = 8

    key = jax.random.PRNGKey(0)
    k_param, k_in = jax.random.split(key)

    params = init_params(k_param, hidden, num_heads)
    hidden_states = jax.random.normal(k_in, (batch, seq, hidden), jnp.float32)

    attn_output, _, _ = falcon_flash_attention2_forward(
        params, hidden_states, num_heads)
    attn_output = jax.block_until_ready(attn_output)

    assert attn_output.shape == (batch, seq, hidden)
    assert bool(jnp.all(jnp.isfinite(attn_output)))

    # sanity check against a pure-JAX f32 reference (loose tol: q/k/v run in bf16)
    ref = _reference_forward(params, hidden_states, num_heads)
    assert bool(jnp.allclose(attn_output, ref, atol=5e-2, rtol=5e-2))

    print("KERNEL_OK")
</pallas_src>

<mosaic_0001>
module attributes {stable_mosaic.version = 11 : i64} {
  func.func @_tiled_linear_kernel(%arg0: i32, %arg1: i32, %arg2: i32, %arg3: memref<16x32xf32, #tpu.memory_space<vmem>>, %arg4: memref<32x96xf32, #tpu.memory_space<vmem>>, %arg5: memref<16x96xf32, #tpu.memory_space<vmem>>, %arg6: memref<16x96xf32, #tpu.memory_space<vmem>>) attributes {dimension_semantics = [#tpu.dimension_semantics<parallel>, #tpu.dimension_semantics<parallel>, #tpu.dimension_semantics<arbitrary>], iteration_bounds = array<i64: 1, 1, 1>, scalar_prefetch = 0 : i64, scratch_operands = 1 : i64, tpu.core_type = #tpu.core_type<tc>, window_params = [{transform_indices = @transform_0, window_bounds = array<i64: 16, 32>}, {transform_indices = @transform_1, window_bounds = array<i64: 32, 96>}, {transform_indices = @transform_2, window_bounds = array<i64: 16, 96>}]} {
    %c0_i32 = arith.constant 0 : i32
    %0 = arith.cmpi eq, %arg2, %c0_i32 : i32
    %1 = arith.extui %0 : i1 to i32
    %c0_i32_0 = arith.constant 0 : i32
    %2 = arith.cmpi ne, %1, %c0_i32_0 : i32
    scf.if %2 {
      %cst_10 = arith.constant 0.000000e+00 : f32
      %12 = vector.broadcast %cst_10 : f32 to vector<16x96xf32>
      %c0_11 = arith.constant 0 : index
      %c0_12 = arith.constant 0 : index
      %13 = vector.load %arg6[%c0_11, %c0_12] : memref<16x96xf32, #tpu.memory_space<vmem>>, vector<16x96xf32>
      tpu.vector_store %arg6[%c0_11, %c0_12], %12 {strides = array<i32>} : memref<16x96xf32, #tpu.memory_space<vmem>>, vector<16x96xf32>,
    } else {
    }
    %c0 = arith.constant 0 : index
    %c0_1 = arith.constant 0 : index
    %3 = vector.load %arg6[%c0, %c0_1] : memref<16x96xf32, #tpu.memory_space<vmem>>, vector<16x96xf32>
    %c0_2 = arith.constant 0 : index
    %c0_3 = arith.constant 0 : index
    %4 = vector.load %arg3[%c0_2, %c0_3] : memref<16x32xf32, #tpu.memory_space<vmem>>, vector<16x32xf32>
    %c0_4 = arith.constant 0 : index
    %c0_5 = arith.constant 0 : index
    %5 = vector.load %arg4[%c0_4, %c0_5] : memref<32x96xf32, #tpu.memory_space<vmem>>, vector<32x96xf32>
    %cst = arith.constant dense<0.000000e+00> : vector<16x96xf32>
    %6 = tpu.matmul %4, %5, %cst {dimension_numbers = #tpu.dot_dimension_numbers<[1], [0], [0], [1], [0, 0, 1, 1], [], []>} : vector<16x32xf32>, vector<32x96xf32>, vector<16x96xf32> -> vector<16x96xf32>
    %7 = arith.addf %3, %6 : vector<16x96xf32>
    %c0_6 = arith.constant 0 : index
    %c0_7 = arith.constant 0 : index
    %8 = vector.load %arg6[%c0_6, %c0_7] : memref<16x96xf32, #tpu.memory_space<vmem>>, vector<16x96xf32>
    tpu.vector_store %arg6[%c0_6, %c0_7], %7 {strides = array<i32>} : memref<16x96xf32, #tpu.memory_space<vmem>>, vector<16x96xf32>,
    %c0_i32_8 = arith.constant 0 : i32
    %9 = arith.cmpi eq, %arg2, %c0_i32_8 : i32
    %10 = arith.extui %9 : i1 to i32
    %c0_i32_9 = arith.constant 0 : i32
    %11 = arith.cmpi ne, %10, %c0_i32_9 : i32
    scf.if %11 {
      %c0_10 = arith.constant 0 : index
      %c0_11 = arith.constant 0 : index
      %12 = vector.load %arg6[%c0_10, %c0_11] : memref<16x96xf32, #tpu.memory_space<vmem>>, vector<16x96xf32>
      %c0_12 = arith.constant 0 : index
      %c0_13 = arith.constant 0 : index
      %13 = vector.load %arg5[%c0_12, %c0_13] : memref<16x96xf32, #tpu.memory_space<vmem>>, vector<16x96xf32>
      tpu.vector_store %arg5[%c0_12, %c0_13], %12 {strides = array<i32>} : memref<16x96xf32, #tpu.memory_space<vmem>>, vector<16x96xf32>,
    } else {
    }
    return
  }
  func.func @transform_0(%arg0: i32, %arg1: i32, %arg2: i32) -> (i32, i32) {
    %c0_i32 = arith.constant 0 : i32
    return %arg0, %arg2 : i32, i32
  }
  func.func @transform_1(%arg0: i32, %arg1: i32, %arg2: i32) -> (i32, i32) {
    %c0_i32 = arith.constant 0 : i32
    return %arg2, %arg1 : i32, i32
  }
  func.func @transform_2(%arg0: i32, %arg1: i32, %arg2: i32) -> (i32, i32) {
    %c0_i32 = arith.constant 0 : i32
    return %arg0, %arg1 : i32, i32
  }
}

</mosaic_0001>

<bundles_post_ra>
// kernel: tpu_custom_call.1
= control target key start
LH: loop header
LB: loop body
LE: loop exit
PB: predicated region body
PF: predicated region fallthrough
CT: control target
= control target key end

     0   :  { %7 = vsyncpa [#allocation4], 0  ;;  %s344_s0 = inlined_call_operand.hbm [shape: f32[16,32], index: 0, kind: input, shape index: {}]   ;;  %s345_s1 = inlined_call_operand.hbm [shape: f32[32,96], index: 1, kind: input, shape index: {}]   ;;  %s346_s2 = inlined_call_operand.hbm [shape: f32[16,96], index: 2, kind: output, shape index: {}]  }
   0x1   :  { %8 = vsyncpa [#allocation7], 0 }
   0x2   :  { %9 = vsyncpa [#allocation5], 0  ;;  %s272_s9 = smov [#allocation3]   ;;  %s200_s13 = scalar_lea.hbm %s344_s0, 256 }
   0x3   :  { %s15_s10 = sshll.u32 %s272_s9, 4  ;;  %p201_p0 = scmp.ne.s32.totalorder %s344_s0, %s200_s13  ;;  %s16_s10 = int_to_ptr.vmem [resolvable:$true] %s15_s10 }
   0x4   :  { %p204_p1 = scmp.lt.u32.totalorder %s200_s13, %s344_s0 }
   0x6   :  { %p206_p2 = pnand %p204_p1, %p201_p0 }
   0x8   :  { %209 = shalt.err (!%p206_p2)
}
   0x9   :  { %s210_s18 = scalar_lea.vmem %s16_s10, 256  ;;  %p215_p4 = scmp.lt.s32.totalorder %s16_s10, %s16_s10 }
   0xa   :  { %p211_p3 = scmp.ne.s32.totalorder %s16_s10, %s210_s18  ;;  %p216_p5 = scmp.lt.s32.totalorder %s210_s18, %s210_s18 }
   0xc   :  { %p217_p6 = por %p216_p5, %p215_p4 }
   0xe   :  { %p218_p7 = pnand %p217_p6, %p211_p3 }
  0x10   :  { %221 = shalt.err (!%p218_p7)
}
  0x11   :  { %s273_s19 = smov 128   ;;  %s274_s20 = smov 8  }
  0x12   :  { %21 = dma.hbm_to_vmem [thread:$0]  %s344_s0, 256, %s16_s10, [#allocation4], %s273_s19, %s273_s19, %s274_s20  }
  0x13   :  { %s275_s23 = smov [#allocation6]   ;;  %s222_s27 = scalar_lea.hbm %s345_s1, 512 }
  0x14   :  { %s27_s24 = sshll.u32 %s275_s23, 4  ;;  %p223_p8 = scmp.ne.s32.totalorder %s345_s1, %s222_s27  ;;  %s28_s24 = int_to_ptr.vmem [resolvable:$true] %s27_s24 }
  0x15   :  { %p226_p9 = scmp.lt.u32.totalorder %s222_s27, %s345_s1 }
  0x17   :  { %p228_p10 = pnand %p226_p9, %p223_p8 }
  0x19   :  { %231 = shalt.err (!%p228_p10)
}
  0x1a   :  { %s232_s4 = scalar_lea.vmem %s28_s24, 512  ;;  %p237_p12 = scmp.lt.s32.totalorder %s28_s24, %s28_s24 }
  0x1b   :  { %p233_p11 = scmp.ne.s32.totalorder %s28_s24, %s232_s4  ;;  %p238_p13 = scmp.lt.s32.totalorder %s232_s4, %s232_s4 }
  0x1d   :  { %p239_p0 = por %p238_p13, %p237_p12 }
  0x1f   :  { %p240_p1 = pnand %p239_p0, %p233_p11 }
  0x21   :  { %243 = shalt.err (!%p240_p1)
}
  0x22   :  { %33 = dma.hbm_to_vmem [thread:$0]  %s345_s1, 512, %s28_s24, [#allocation7], %s273_s19, %s273_s19, %s274_s20  }
  0x23   :  { %266 = dma.done.wait [#allocation4], 256  }
  0x24   :  { %267 = vsyncadd [#allocation4], 4294967040 }
  0x25   :  { %268 = dma.done.wait [#allocation7], 512  }
  0x26   :  { %269 = vsyncadd [#allocation7], 4294966784  ;;  %vm44_vm0 = vcmask 785408   ;;  %v276_v0 = vmov 0.0   ;;  %vm55_vm1 = vcmask 261120   ;;  %v51_v1 = vld [vmem:[#allocation6] sm:$0xff] }
  0x27   :  { %46 = vst.msk [vmem:[#allocation2 + $0x8] sm:$0xff] %vm44_vm0, %v276_v0  ;;  %45 = vst.msk [vmem:[#allocation2] sm:$0xff] %vm44_vm0, %v276_v0  ;;  %v52_v2 = vld [vmem:[#allocation6 + $0x8] sm:$0xff]  ;;  %v53_v3 = vld [vmem:[#allocation6 + $0x10] sm:$0xff]  ;;  %s277_s1 = smov [#allocation8]  }
  0x28   :  { %v186_v4 = vpack.c.bf16 %v52_v2, %v51_v1  ;;  %v54_v5 = vld [vmem:[#allocation6 + $0x18] sm:$0xff]  ;;  %v49_v6 = vld [vmem:[#allocation3] sm:$0xff]  ;;  %s154_s6 = sshll.u32 %s277_s1, 4  ;;  %s155_s6 = int_to_ptr.vmem [resolvable:$true] %s154_s6 }
  0x29   :  { %v190_v7 = vpack.c.bf16 %v54_v5, %v53_v3  ;;  %183 = vmatprep.mubr.msk.f32.mxu0 %vm55_vm1, %v49_v6  ;;  %v50_v8 = vld [vmem:[#allocation3 + $0x8] sm:$0xff]  ;;  %s244_s7 = scalar_lea.vmem %s155_s6, 256  ;;  %p249_p3 = scmp.lt.s32.totalorder %s155_s6, %s155_s6 }
  0x2a   :  { %187 = vmatprep.subr.bf16.mxu0 %v186_v4  ;;  %p245_p2 = scmp.ne.s32.totalorder %s155_s6, %s244_s7  ;;  %p250_p4 = scmp.lt.s32.totalorder %s244_s7, %s244_s7 }
  0x2b   :  { %189 = vmatpush3.bf16.msra.mxu0 %v186_v4 }
  0x2c   :  { %191 = vmatprep.subr.bf16.mxu0 %v190_v7  ;;  %p251_p5 = por %p250_p4, %p249_p3 }
  0x2e   :  { %v48_v9 = vld [vmem:[#allocation2 + $0x8] sm:$0xff]  ;;  %v47_v10 = vld [vmem:[#allocation2] sm:$0xff]  ;;  %p252_p6 = pnand %p251_p5, %p245_p2 }
  0x2f   :  { %193 = vmatpush3.bf16.msra.mxu0 %v190_v7 }
  0x32   :  { %184 = vmatmul.mubr.msk.f32.vlgmr.msra.gmra.mrb[0].mxu0 %vm55_vm1, %v50_v8 }
 0x105   :  { %v185_v11 = vpop.f32.mrb[0].mxu0 }
 0x106   :  { %v138_v12 = vadd.f32 %v185_v11, %v48_v9  ;;  %v128_v13 = vpop.f32.mrb[1].mxu0 }
 0x107   :  { %v137_v14 = vadd.f32 %v128_v13, %v47_v10 }
 0x108   :  { %141 = vst.msk [vmem:[#allocation2 + $0x8] sm:$0xff] %vm44_vm0, %v138_v12 }
 0x109   :  { %140 = vst.msk [vmem:[#allocation2] sm:$0xff] %vm44_vm0, %v137_v14 }
 0x10f   :  { %v146_v15 = vld [vmem:[#allocation2 + $0x8] sm:$0xff] }
 0x110   :  { %v145_v16 = vld [vmem:[#allocation2] sm:$0xff]  ;;  %148 = vst.msk [vmem:[#allocation8 + $0x8] sm:$0xff] %vm44_vm0, %v146_v15 }
 0x111   :  { %147 = vst.msk [vmem:[#allocation8] sm:$0xff] %vm44_vm0, %v145_v16 }
 0x112   :  { %255 = shalt.err (!%p252_p6)
}
 0x113   :  { %s256_s10 = scalar_lea.hbm %s346_s2, 256 }
 0x114   :  { %p257_p7 = scmp.ne.s32.totalorder %s346_s2, %s256_s10  ;;  %p260_p8 = scmp.lt.u32.totalorder %s256_s10, %s346_s2 }
 0x116   :  { %p262_p9 = pnand %p260_p8, %p257_p7 }
 0x118   :  { %265 = shalt.err (!%p262_p9)
}
 0x119   :  { %160 = dma.vmem_to_hbm [thread:$0]  %s155_s6, 256, %s346_s2, [#allocation5], %s273_s19, %s273_s19, %s274_s20  }
 0x11a   :  { %270 = dma.done.wait [#allocation5], 256  }
 0x11b   :  { %271 = vsyncadd [#allocation5], 4294967040 }
 0x11c   :  { %164 = vsyncpa [#allocation4], 1 }
 0x11d   :  { %165 = vsyncpa [#allocation7], 1 }
 0x11e   :  { %166 = vsyncpa [#allocation5], 1 }

</bundles_post_ra>
